<compile_context>
chip_gen: v7x
topology: tpu7x:2x2x1
jax: 0.10.0
libtpu: 0.0.40
codegen_flags: <defaults>
</compile_context>

<pallas_src>
import math

import jax
import jax.numpy as jnp
from jax.experimental import pallas as pl
from jax.experimental.pallas import tpu as pltpu

# ---- model dimensions (small shapes implied by the module) ----
IN_DIM = 16      # input_dim
MID1 = 32        # mid_output_dtw_1
MID2 = 24        # mid_output_dtw_2
OUT_DIM = 8      # final_output
N_X = 6          # rows of x
N_M = 4          # rows of music_params

LANES = 128      # lane width of the packed parameter slab / working layout

# ---- packed parameter-slab layout (all row offsets are multiples of 8) ----
W1_R = 0                     # rows [0, 16)    : W1 (IN_DIM x MID1), lanes >= MID1 zero
B1_R = IN_DIM                # row 16          : b1
W2_R = 24                    # rows [24, 152)  : W2 padded to (128 x 128); rows>=MID1, cols>=MID2 zero
B2_R = W2_R + LANES          # row 152         : b2
W3_R = 160                   # rows [160, 288) : W3 padded to (128 x 128); rows>=MID2, cols>=OUT zero
B3_R = W3_R + LANES          # row 288         : b3
SLAB_ROWS = 296              # 289 rows used, padded up to a multiple of 8


def combiner_kernel(x_ref, p_ref, o_ref):
    """x_ref: (N, IN_DIM) f32; p_ref: (SLAB_ROWS, 128) f32; o_ref: (N, 128) f32."""
    x = x_ref[...]                                     # (N, IN_DIM)

    # Zero-cost static views into the packed parameter slab (8-aligned rows, full lanes).
    w1 = p_ref[W1_R:W1_R + IN_DIM, :]                  # (IN_DIM, 128)
    b1 = p_ref[B1_R:B1_R + 1, :]                       # (1, 128)
    w2 = p_ref[W2_R:W2_R + LANES, :]                   # (128, 128)
    b2 = p_ref[B2_R:B2_R + 1, :]                       # (1, 128)
    w3 = p_ref[W3_R:W3_R + LANES, :]                   # (128, 128)
    b3 = p_ref[B3_R:B3_R + 1, :]                       # (1, 128)

    # linear1 -> ReLU   (columns >= MID1 are exactly zero after ReLU)
    h = jnp.maximum(jnp.dot(x, w1, preferred_element_type=jnp.float32) + b1, 0.0)
    # linear2 -> ReLU   (columns >= MID2 are exactly zero after ReLU)
    h = jnp.maximum(jnp.dot(h, w2, preferred_element_type=jnp.float32) + b2, 0.0)
    # TODO(synk): nn.Dropout(p=0.2) treated as identity (inference mode).
    # linear3           (columns >= OUT_DIM are exactly zero; lane-dense store)
    o_ref[...] = jnp.dot(h, w3, preferred_element_type=jnp.float32) + b3


def pack_params(params):
    """Pack all 6 weight/bias tensors into one lane-dense (SLAB_ROWS, 128) f32 slab."""
    slab = jnp.zeros((SLAB_ROWS, LANES), jnp.float32)
    slab = slab.at[W1_R:W1_R + IN_DIM, 0:MID1].set(params["w1"])
    slab = slab.at[B1_R, 0:MID1].set(params["b1"])
    slab = slab.at[W2_R:W2_R + MID1, 0:MID2].set(params["w2"])
    slab = slab.at[B2_R, 0:MID2].set(params["b2"])
    slab = slab.at[W3_R:W3_R + MID2, 0:OUT_DIM].set(params["w3"])
    slab = slab.at[B3_R, 0:OUT_DIM].set(params["b3"])
    return slab


def init_params(key):
    """Deterministic synthetic parameters matching nn.Linear shapes (stored as (in, out))."""
    ks = jax.random.split(key, 3)

    def linear(k, fan_in, fan_out):
        bound = 1.0 / math.sqrt(fan_in)
        kw, kb = jax.random.split(k)
        w = jax.random.uniform(kw, (fan_in, fan_out), jnp.float32, -bound, bound)
        b = jax.random.uniform(kb, (fan_out,), jnp.float32, -bound, bound)
        return w, b

    w1, b1 = linear(ks[0], IN_DIM, MID1)
    w2, b2 = linear(ks[1], MID1, MID2)
    w3, b3 = linear(ks[2], MID2, OUT_DIM)
    return dict(w1=w1, b1=b1, w2=w2, b2=b2, w3=w3, b3=b3)


@jax.jit
def combiner(x, music_params, param_slab):
    """x: (N_X, IN_DIM), music_params: (N_M, IN_DIM) -> (N_X + N_M, OUT_DIM) f32."""
    xin = jnp.concatenate(
        [x.astype(jnp.float32), music_params.astype(jnp.float32)], axis=0)   # torch.cat dim=0
    n_tot = xin.shape[0]

    vmem = pl.BlockSpec(memory_space=pltpu.MemorySpace.VMEM)
    out_padded = pl.pallas_call(
        combiner_kernel,
        out_shape=jax.ShapeDtypeStruct((n_tot, LANES), jnp.float32),
        in_specs=[vmem, vmem],
        out_specs=vmem,
    )(xin, param_slab)
    # Padded lanes are exact zeros; keep only the real output features.
    return out_padded[:, :OUT_DIM]


def combiner_ref(x, music_params, params):
    """Pure-JAX reference of the PyTorch forward (dropout = identity)."""
    h = jnp.concatenate([x, music_params], axis=0).astype(jnp.float32)
    hp = jax.lax.Precision.HIGHEST
    h = jnp.maximum(jnp.dot(h, params["w1"], precision=hp) + params["b1"], 0.0)
    h = jnp.maximum(jnp.dot(h, params["w2"], precision=hp) + params["b2"], 0.0)
    return jnp.dot(h, params["w3"], precision=hp) + params["b3"]


if __name__ == "__main__":
    key = jax.random.PRNGKey(0)
    k_param, k_x, k_m = jax.random.split(key, 3)

    params = init_params(k_param)
    param_slab = pack_params(params)                      # built once, reused per call

    x = jax.random.normal(k_x, (N_X, IN_DIM), jnp.float32)
    music_params = jax.random.normal(k_m, (N_M, IN_DIM), jnp.float32)

    out = combiner(x, music_params, param_slab)
    jax.block_until_ready(out)
    assert out.shape == (N_X + N_M, OUT_DIM)

    ref = combiner_ref(x, music_params, params)
    assert bool(jnp.allclose(out, ref, rtol=1e-3, atol=1e-3)), "mismatch vs pure-JAX reference"

    print("KERNEL_OK")
</pallas_src>

<mosaic_0001>
module attributes {stable_mosaic.version = 11 : i64} {
  func.func @combiner_kernel(%arg0: memref<10x16xf32, #tpu.memory_space<vmem>>, %arg1: memref<296x128xf32, #tpu.memory_space<vmem>>, %arg2: memref<10x128xf32, #tpu.memory_space<vmem>>) attributes {dimension_semantics = [], scalar_prefetch = 0 : i64, scratch_operands = 0 : i64, tpu.core_type = #tpu.core_type<tc>} {
    %c0 = arith.constant 0 : index
    %c0_0 = arith.constant 0 : index
    %0 = vector.load %arg0[%c0, %c0_0] : memref<10x16xf32, #tpu.memory_space<vmem>>, vector<10x16xf32>
    %c0_1 = arith.constant 0 : index
    %c0_2 = arith.constant 0 : index
    %1 = vector.load %arg1[%c0_1, %c0_2] : memref<296x128xf32, #tpu.memory_space<vmem>>, vector<16x128xf32>
    %c16 = arith.constant 16 : index
    %c0_3 = arith.constant 0 : index
    %2 = vector.load %arg1[%c16, %c0_3] : memref<296x128xf32, #tpu.memory_space<vmem>>, vector<1x128xf32>
    %c24 = arith.constant 24 : index
    %c0_4 = arith.constant 0 : index
    %3 = vector.load %arg1[%c24, %c0_4] : memref<296x128xf32, #tpu.memory_space<vmem>>, vector<128x128xf32>
    %c152 = arith.constant 152 : index
    %c0_5 = arith.constant 0 : index
    %4 = vector.load %arg1[%c152, %c0_5] : memref<296x128xf32, #tpu.memory_space<vmem>>, vector<1x128xf32>
    %c160 = arith.constant 160 : index
    %c0_6 = arith.constant 0 : index
    %5 = vector.load %arg1[%c160, %c0_6] : memref<296x128xf32, #tpu.memory_space<vmem>>, vector<128x128xf32>
    %c288 = arith.constant 288 : index
    %c0_7 = arith.constant 0 : index
    %6 = vector.load %arg1[%c288, %c0_7] : memref<296x128xf32, #tpu.memory_space<vmem>>, vector<1x128xf32>
    %cst = arith.constant dense<0.000000e+00> : vector<10x128xf32>
    %7 = tpu.matmul %0, %1, %cst {dimension_numbers = #tpu.dot_dimension_numbers<[1], [0], [0], [1], [0, 0, 1, 1], [], []>} : vector<10x16xf32>, vector<16x128xf32>, vector<10x128xf32> -> vector<10x128xf32>
    %8 = vector.broadcast %2 : vector<1x128xf32> to vector<10x128xf32>
    %9 = arith.addf %7, %8 : vector<10x128xf32>
    %cst_8 = arith.constant 0.000000e+00 : f32
    %10 = vector.broadcast %cst_8 : f32 to vector<10x128xf32>
    %11 = arith.maximumf %9, %10 : vector<10x128xf32>
    %cst_9 = arith.constant dense<0.000000e+00> : vector<10x128xf32>
    %12 = tpu.matmul %11, %3, %cst_9 {dimension_numbers = #tpu.dot_dimension_numbers<[1], [0], [0], [1], [0, 0, 1, 1], [], []>} : vector<10x128xf32>, vector<128x128xf32>, vector<10x128xf32> -> vector<10x128xf32>
    %13 = vector.broadcast %4 : vector<1x128xf32> to vector<10x128xf32>
    %14 = arith.addf %12, %13 : vector<10x128xf32>
    %cst_10 = arith.constant 0.000000e+00 : f32
    %15 = vector.broadcast %cst_10 : f32 to vector<10x128xf32>
    %16 = arith.maximumf %14, %15 : vector<10x128xf32>
    %cst_11 = arith.constant dense<0.000000e+00> : vector<10x128xf32>
    %17 = tpu.matmul %16, %5, %cst_11 {dimension_numbers = #tpu.dot_dimension_numbers<[1], [0], [0], [1], [0, 0, 1, 1], [], []>} : vector<10x128xf32>, vector<128x128xf32>, vector<10x128xf32> -> vector<10x128xf32>
    %18 = vector.broadcast %6 : vector<1x128xf32> to vector<10x128xf32>
    %19 = arith.addf %17, %18 : vector<10x128xf32>
    %c0_12 = arith.constant 0 : index
    %c0_13 = arith.constant 0 : index
    %20 = vector.load %arg2[%c0_12, %c0_13] : memref<10x128xf32, #tpu.memory_space<vmem>>, vector<10x128xf32>
    tpu.vector_store %arg2[%c0_12, %c0_13], %19 {strides = array<i32>} : memref<10x128xf32, #tpu.memory_space<vmem>>, vector<10x128xf32>,
    return
  }
}

</mosaic_0001>

<bundles_post_ra>
// kernel: combiner.1
= control target key start
LH: loop header
LB: loop body
LE: loop exit
PB: predicated region body
PF: predicated region fallthrough
CT: control target
= control target key end

     0   :  { %7 = vsyncpa [#allocation3], 0  ;;  %s536_s9 = smov [#allocation2]   ;;  %s580_s0 = inlined_call_operand.vmem [shape: f32[10,16], index: 0, kind: input, shape index: {}]   ;;  %s581_s1 = inlined_call_operand.hbm [shape: f32[296,128], index: 1, kind: input, shape index: {}]   ;;  %s582_s2 = inlined_call_operand.vmem [shape: f32[10,128], index: 2, kind: output, shape index: {}]  }
   0x1   :  { %s15_s10 = sshll.u32 %s536_s9, 4  ;;  %s512_s13 = scalar_lea.hbm %s581_s1, 4736  ;;  %s16_s10 = int_to_ptr.vmem [resolvable:$true] %s15_s10 }
   0x2   :  { %p513_p0 = scmp.ne.s32.totalorder %s581_s1, %s512_s13  ;;  %p516_p1 = scmp.lt.u32.totalorder %s512_s13, %s581_s1 }
   0x4   :  { %p518_p2 = pnand %p516_p1, %p513_p0 }
   0x6   :  { %521 = shalt.err (!%p518_p2)
}
   0x7   :  { %s522_s18 = scalar_lea.vmem %s16_s10, 4736  ;;  %p527_p4 = scmp.lt.s32.totalorder %s16_s10, %s16_s10 }
   0x8   :  { %p523_p3 = scmp.ne.s32.totalorder %s16_s10, %s522_s18  ;;  %p528_p5 = scmp.lt.s32.totalorder %s522_s18, %s522_s18 }
   0xa   :  { %p529_p6 = por %p528_p5, %p527_p4 }
   0xc   :  { %p530_p7 = pnand %p529_p6, %p523_p3 }
   0xe   :  { %533 = shalt.err (!%p530_p7)
}
   0xf   :  { %s537_s19 = smov 128   ;;  %s538_s20 = smov 8  }
  0x10   :  { %21 = dma.hbm_to_vmem [thread:$0]  %s581_s1, 4736, %s16_s10, [#allocation3], %s537_s19, %s537_s19, %s538_s20  }
  0x11   :  { %534 = dma.done.wait [#allocation3], 4736  }
  0x12   :  { %535 = vsyncadd [#allocation3], 4294962560  ;;  %vm68_vm0 = vcmask 130048   ;;  %v27_v0 = vld [vmem:[#allocation2] sm:$0xff]  ;;  %v28_v1 = vld [vmem:[#allocation2 + $0x8] sm:$0xff] }
  0x13   :  { %v25_v2 = vld [vmem:[%s580_s0] sm:$0xff]  ;;  %v441_v3 = vpack.c.bf16 %v28_v1, %v27_v0  ;;  %v30_v4 = vld [vmem:[#allocation2 + $0x18] sm:$0xff]  ;;  %v32_v7 = vld [vmem:[#allocation2 + $0x28] sm:$0xff] }
  0x14   :  { %368 = vmatprep.mubr.msk.f32.mxu0 %vm68_vm0, %v25_v2  ;;  %v31_v5 = vld [vmem:[#allocation2 + $0x20] sm:$0xff]  ;;  %v33_v8 = vld [vmem:[#allocation2 + $0x30] sm:$0xff]  ;;  %v34_v10 = vld [vmem:[#allocation2 + $0x38] sm:$0xff] }
  0x15   :  { %v445_v6 = vpack.c.bf16 %v31_v5, %v30_v4  ;;  %442 = vmatprep.subr.bf16.mxu0 %v441_v3  ;;  %v449_v9 = vpack.c.bf16 %v33_v8, %v32_v7  ;;  %v35_v11 = vld [vmem:[#allocation2 + $0x40] sm:$0xff]  ;;  %v26_v12 = vld [vmem:[%s580_s0 + $0x8] sm:$0x3]  ;;  %v37_v15 = vld [vmem:[#allocation2 + $0x50] sm:$0xff] }
  0x16   :  { %444 = vmatpush3.bf16.msra.mxu0 %v441_v3  ;;  %v453_v13 = vpack.c.bf16 %v35_v11, %v34_v10  ;;  %v36_v14 = vld [vmem:[#allocation2 + $0x48] sm:$0xff]  ;;  %v38_v17 = vld [vmem:[#allocation2 + $0x58] sm:$0xff]  ;;  %v39_v18 = vld [vmem:[#allocation2 + $0x60] sm:$0xff] }
  0x17   :  { %446 = vmatprep.subr.bf16.mxu1 %v445_v6  ;;  %v457_v16 = vpack.c.bf16 %v37_v15, %v36_v14  ;;  %v461_v19 = vpack.c.bf16 %v39_v18, %v38_v17  ;;  %v40_v20 = vld [vmem:[#allocation2 + $0x68] sm:$0xff]  ;;  %v41_v21 = vld [vmem:[#allocation2 + $0x70] sm:$0xff]  ;;  %v42_v23 = vld [vmem:[#allocation2 + $0x78] sm:$0xff] }
  0x18   :  { %448 = vmatpush3.bf16.msra.mxu1 %v445_v6  ;;  %v465_v22 = vpack.c.bf16 %v41_v21, %v40_v20  ;;  %v43_v24 = vld [vmem:[#allocation2 + $0x80] sm:$0xff]  ;;  %v44_v26 = vld [vmem:[#allocation2 + $0x88] sm:$0xff]  ;;  %v45_v27 = vld [vmem:[#allocation2 + $0x90] sm:$0xff] }
  0x19   :  { %450 = vmatprep.subr.bf16.mxu1 %v449_v9  ;;  %369 = vmatmul.mubr.msk.f32.vlgmr.msra.gmra.mrb[0].mxu0 %vm68_vm0, %v26_v12  ;;  %v469_v25 = vpack.c.bf16 %v43_v24, %v42_v23  ;;  %v473_v28 = vpack.c.bf16 %v45_v27, %v44_v26  ;;  %v47_v29 = vld [vmem:[#allocation2 + $0xa0] sm:$0xff]  ;;  %v48_v30 = vld [vmem:[#allocation2 + $0xa8] sm:$0xff]  ;;  %v49_v31 = vld [vmem:[#allocation2 + $0xb0] sm:$0xff] }
  0x1a   :  { %v477_v32 = vpack.c.bf16 %v48_v30, %v47_v29  ;;  %v50_v33 = vld [vmem:[#allocation2 + $0xb8] sm:$0xff]  ;;  %v51_v35 = vld [vmem:[#allocation2 + $0xc0] sm:$0xff]  ;;  %v52_v36 = vld [vmem:[#allocation2 + $0xc8] sm:$0xff] }
  0x1b   :  { %v481_v34 = vpack.c.bf16 %v50_v33, %v49_v31  ;;  %v485_v37 = vpack.c.bf16 %v52_v36, %v51_v35  ;;  %v53_v38 = vld [vmem:[#allocation2 + $0xd0] sm:$0xff]  ;;  %v54_v39 = vld [vmem:[#allocation2 + $0xd8] sm:$0xff]  ;;  %v55_v41 = vld [vmem:[#allocation2 + $0xe0] sm:$0xff] }
  0x1c   :  { %452 = vmatpush3.bf16.msra.mxu1 %v449_v9  ;;  %478 = vmatprep.subr.bf16.mxu0 %v477_v32  ;;  %v489_v40 = vpack.c.bf16 %v54_v39, %v53_v38  ;;  %v56_v42 = vld [vmem:[#allocation2 + $0xe8] sm:$0xff]  ;;  %v57_v44 = vld [vmem:[#allocation2 + $0xf0] sm:$0xff]  ;;  %v58_v45 = vld [vmem:[#allocation2 + $0xf8] sm:$0xff] }
  0x1d   :  { %454 = vmatprep.subr.bf16.mxu1 %v453_v13  ;;  %480 = vmatpush3.bf16.msra.mxu0 %v477_v32  ;;  %v493_v43 = vpack.c.bf16 %v56_v42, %v55_v41  ;;  %v497_v46 = vpack.c.bf16 %v58_v45, %v57_v44  ;;  %v59_v47 = vld [vmem:[#allocation2 + $0x100] sm:$0xff]  ;;  %v60_v48 = vld [vmem:[#allocation2 + $0x108] sm:$0xff]  ;;  %v319_v50 = vld [vmem:[#allocation2 + $0x10] ss:$0 sm:$0xff] }
  0x1e   :  { %482 = vmatprep.subr.bf16.mxu0 %v481_v34  ;;  %v501_v49 = vpack.c.bf16 %v60_v48, %v59_v47  ;;  %v61_v57 = vld [vmem:[#allocation2 + $0x110] sm:$0xff]  ;;  %v62_v58 = vld [vmem:[#allocation2 + $0x118] sm:$0xff]  ;;  %v323_v3 = vld [vmem:[#allocation2 + $0x120] ss:$0 sm:$0xff] }
  0x1f   :  { %v505_v59 = vpack.c.bf16 %v62_v58, %v61_v57  ;;  %v322_v60 = vld [vmem:[#allocation2 + $0x98] ss:$0 sm:$0xff] }
  0x20   :  { %456 = vmatpush3.bf16.msra.mxu1 %v453_v13 }
  0x21   :  { %458 = vmatprep.subr.bf16.mxu1 %v457_v16  ;;  %484 = vmatpush3.bf16.msra.mxu0 %v481_v34 }
  0x22   :  { %486 = vmatprep.subr.bf16.mxu0 %v485_v37 }
  0x24   :  { %460 = vmatpush3.bf16.msra.mxu1 %v457_v16 }
  0x25   :  { %462 = vmatprep.subr.bf16.mxu1 %v461_v19  ;;  %488 = vmatpush3.bf16.msra.mxu0 %v485_v37 }
  0x26   :  { %490 = vmatprep.subr.bf16.mxu0 %v489_v40 }
  0x28   :  { %464 = vmatpush3.bf16.msra.mxu1 %v461_v19 }
  0x29   :  { %466 = vmatprep.subr.bf16.mxu1 %v465_v22  ;;  %492 = vmatpush3.bf16.msra.mxu0 %v489_v40 }
  0x2a   :  { %494 = vmatprep.subr.bf16.mxu0 %v493_v43 }
  0x2c   :  { %468 = vmatpush3.bf16.msra.mxu1 %v465_v22 }
  0x2d   :  { %470 = vmatprep.subr.bf16.mxu1 %v469_v25  ;;  %496 = vmatpush3.bf16.msra.mxu0 %v493_v43 }
  0x2e   :  { %498 = vmatprep.subr.bf16.mxu0 %v497_v46 }
  0x30   :  { %472 = vmatpush3.bf16.msra.mxu1 %v469_v25 }
  0x31   :  { %474 = vmatprep.subr.bf16.mxu1 %v473_v28  ;;  %500 = vmatpush3.bf16.msra.mxu0 %v497_v46 }
  0x32   :  { %502 = vmatprep.subr.bf16.mxu0 %v501_v49 }
  0x34   :  { %476 = vmatpush3.bf16.msra.mxu1 %v473_v28 }
  0x35   :  { %504 = vmatpush3.bf16.msra.mxu0 %v501_v49 }
  0x36   :  { %506 = vmatprep.subr.bf16.mxu0 %v505_v59 }
  0x39   :  { %508 = vmatpush3.bf16.msra.mxu0 %v505_v59 }
  0xec   :  { %v370_v51 = vpop.f32.mrb[0].mxu0 }
  0xed   :  { %v147_v52 = vadd.f32 %v370_v51, %v319_v50  ;;  %v141_v53 = vpop.f32.mrb[1].mxu0 }
  0xee   :  { %v142_v54 = vadd.f32 %v319_v50, %v141_v53 }
  0xef   :  { %v151_v56 = vmax.f32 %v147_v52, 0.0 }
  0xf0   :  { %v150_v55 = vmax.f32 %v142_v54, 0.0 }
  0xf2   :  { %403 = vmatprep.mubr.f32.mxu1 %v150_v55 }
  0xf3   :  { %404 = vmatmul.mubr.f32.vlgmr.msra.gmra.mrb[0].mxu1 %v151_v56 }
 0x1c6   :  { %v405_v61 = vpop.f32.mrb[0].mxu1 }
 0x1c7   :  { %v228_v62 = vadd.f32 %v405_v61, %v322_v60  ;;  %v222_v63 = vpop.f32.mrb[1].mxu1 }
 0x1c8   :  { %v223_v0 = vadd.f32 %v322_v60, %v222_v63 }
 0x1c9   :  { %v232_v2 = vmax.f32 %v228_v62, 0.0 }
 0x1ca   :  { %v231_v1 = vmax.f32 %v223_v0, 0.0 }
 0x1cc   :  { %438 = vmatprep.mubr.f32.mxu0 %v231_v1 }
 0x1cd   :  { %439 = vmatmul.mubr.f32.vlgmr.msra.gmra.mrb[2].mxu0 %v232_v2 }
 0x2a0   :  { %v440_v4 = vpop.f32.mrb[2].mxu0 }
 0x2a1   :  { %v309_v5 = vadd.f32 %v440_v4, %v323_v3  ;;  %v303_v6 = vpop.f32.mrb[3].mxu0 }
 0x2a2   :  { %v304_v7 = vadd.f32 %v323_v3, %v303_v6 }
 0x2a3   :  { %313 = vst [vmem:[%s582_s2 + $0x8] sm:$0x3] %v309_v5 }
 0x2a4   :  { %312 = vst [vmem:[%s582_s2] sm:$0xff] %v304_v7 }
 0x2a5   :  { %318 = vsyncpa [#allocation3], 1 }

</bundles_post_ra>
